<compile_context>
chip_gen: v7x
topology: tpu7x:2x2x1
jax: 0.10.0
libtpu: 0.0.40
codegen_flags: <defaults>
</compile_context>

<pallas_src>
import jax
import jax.numpy as jnp
from jax.experimental import pallas as pl
from jax.experimental.pallas import tpu as pltpu

LANE = 128
SUBLANE = 8


def _round_up(x, m):
    return (x + m - 1) // m * m


# ------------------------------ the fc kernel ---------------------------------
def _fc_kernel(feats_ref, w_ref, b_ref, out_ref):
    # feats: (TILE_M, Dp) bf16, w: (Dp, Cp) bf16, b: (1, Cp) f32 -> out (TILE_M, Cp) f32
    out_ref[...] = (
        jnp.dot(feats_ref[...], w_ref[...], preferred_element_type=jnp.float32)
        + b_ref[...]
    )


def fc_forward(feats, w_t, b, *, tile_m=256):
    """c = feats @ w_t + b  (tiled over the instance axis N).

    feats : (N, D) float32   flattened features
    w_t   : (D, C) float32   Linear weight pre-transposed to (in, out)
    b     : (C,)   float32   Linear bias
    """
    N, D = feats.shape
    C = w_t.shape[1]

    # Pad feature dim to a lane multiple (no-op when already aligned) and the
    # small output-class dim to a full 128-lane tile for lane-dense stores.
    Dp = _round_up(D, LANE)
    Cp = _round_up(max(C, LANE), LANE)

    feats_mxu = feats.astype(jnp.bfloat16)
    if Dp != D:
        feats_mxu = jnp.pad(feats_mxu, ((0, 0), (0, Dp - D)))
    w_pad = jnp.zeros((Dp, Cp), jnp.bfloat16).at[:D, :C].set(w_t.astype(jnp.bfloat16))
    b_pad = jnp.zeros((1, Cp), jnp.float32).at[0, :C].set(b.astype(jnp.float32))

    tile_m = max(SUBLANE, min(tile_m, _round_up(N, SUBLANE)))
    grid = (pl.cdiv(N, tile_m),)

    c_pad = pl.pallas_call(
        _fc_kernel,
        out_shape=jax.ShapeDtypeStruct((N, Cp), jnp.float32),
        grid_spec=pltpu.PrefetchScalarGridSpec(
            num_scalar_prefetch=0,
            grid=grid,
            in_specs=[
                pl.BlockSpec((tile_m, Dp), lambda i: (i, 0)),   # streamed N tiles
                pl.BlockSpec((Dp, Cp), lambda i: (0, 0)),       # grid-invariant weight
                pl.BlockSpec((1, Cp), lambda i: (0, 0)),        # grid-invariant bias
            ],
            out_specs=pl.BlockSpec((tile_m, Cp), lambda i: (i, 0)),
        ),
        compiler_params=pltpu.CompilerParams(
            dimension_semantics=("parallel",),
            vmem_limit_bytes=48 * 1024 * 1024,
        ),
    )(feats_mxu, w_pad, b_pad)

    return c_pad[:, :C]


# ------------------------------ forward wrapper --------------------------------
def iclassifier_forward(x, params):
    # feature_extractor is external to this module -> identity/flatten stand-in.
    feats = x.reshape(x.shape[0], -1)                  # feats.view(N, -1)
    c = fc_forward(feats, params["w_fc"].T, params["b_fc"])
    return feats, c


# ------------------------------ parameter setup --------------------------------
def init_params(key, feature_size, output_class):
    """PyTorch-default-style uniform(-1/sqrt(fan_in), 1/sqrt(fan_in)) init."""
    kw, kb = jax.random.split(key)
    bound = 1.0 / float(feature_size) ** 0.5
    w_fc = jax.random.uniform(kw, (output_class, feature_size), jnp.float32,
                              -bound, bound)
    b_fc = jax.random.uniform(kb, (output_class,), jnp.float32, -bound, bound)
    return dict(w_fc=w_fc, b_fc=b_fc)


if __name__ == "__main__":
    key = jax.random.PRNGKey(0)
    k_x, k_p = jax.random.split(key)

    # x: (N instances, channels, H, W); feature_size = 32*4*4 = 512, 4 classes.
    N, Ch, H, W = 64, 32, 4, 4
    output_class = 4
    feature_size = Ch * H * W

    x = jax.random.normal(k_x, (N, Ch, H, W), jnp.float32)
    params = init_params(k_p, feature_size, output_class)

    feats, c = iclassifier_forward(x, params)
    jax.block_until_ready(feats)
    jax.block_until_ready(c)

    assert feats.shape == (N, feature_size)
    assert c.shape == (N, output_class)

    # f32 reference check (bf16 MXU inputs => small numerical deviation).
    c_ref = feats @ params["w_fc"].T + params["b_fc"]
    max_err = float(jnp.max(jnp.abs(c - c_ref)))
    assert max_err < 1e-1, f"max abs error {max_err}"

    print("KERNEL_OK")
</pallas_src>

<mosaic_0001>
module attributes {stable_mosaic.version = 11 : i64} {
  func.func @_fc_kernel(%arg0: i32, %arg1: memref<64x512xbf16, #tpu.memory_space<vmem>>, %arg2: memref<512x128xbf16, #tpu.memory_space<vmem>>, %arg3: memref<1x128xf32, #tpu.memory_space<vmem>>, %arg4: memref<64x128xf32, #tpu.memory_space<vmem>>) attributes {dimension_semantics = [#tpu.dimension_semantics<parallel>], iteration_bounds = array<i64: 1>, scalar_prefetch = 0 : i64, scratch_operands = 0 : i64, tpu.core_type = #tpu.core_type<tc>, window_params = [{transform_indices = @transform_0, window_bounds = array<i64: 64, 512>}, {pipeline_mode = #tpu.pipeline_mode<synchronous>, transform_indices = @transform_1, window_bounds = array<i64: 512, 128>}, {pipeline_mode = #tpu.pipeline_mode<synchronous>, transform_indices = @transform_2, window_bounds = array<i64: 1, 128>}, {transform_indices = @transform_3, window_bounds = array<i64: 64, 128>}]} {
    %c0 = arith.constant 0 : index
    %c0_0 = arith.constant 0 : index
    %0 = vector.load %arg1[%c0, %c0_0] : memref<64x512xbf16, #tpu.memory_space<vmem>>, vector<64x512xbf16>
    %c0_1 = arith.constant 0 : index
    %c0_2 = arith.constant 0 : index
    %1 = vector.load %arg2[%c0_1, %c0_2] : memref<512x128xbf16, #tpu.memory_space<vmem>>, vector<512x128xbf16>
    %cst = arith.constant dense<0.000000e+00> : vector<64x128xf32>
    %2 = tpu.matmul %0, %1, %cst {dimension_numbers = #tpu.dot_dimension_numbers<[1], [0], [0], [1], [0, 0, 1, 1], [], []>} : vector<64x512xbf16>, vector<512x128xbf16>, vector<64x128xf32> -> vector<64x128xf32>
    %c0_3 = arith.constant 0 : index
    %c0_4 = arith.constant 0 : index
    %3 = vector.load %arg3[%c0_3, %c0_4] : memref<1x128xf32, #tpu.memory_space<vmem>>, vector<1x128xf32>
    %4 = vector.broadcast %3 : vector<1x128xf32> to vector<64x128xf32>
    %5 = arith.addf %2, %4 : vector<64x128xf32>
    %c0_5 = arith.constant 0 : index
    %c0_6 = arith.constant 0 : index
    %6 = vector.load %arg4[%c0_5, %c0_6] : memref<64x128xf32, #tpu.memory_space<vmem>>, vector<64x128xf32>
    tpu.vector_store %arg4[%c0_5, %c0_6], %5 {strides = array<i32>} : memref<64x128xf32, #tpu.memory_space<vmem>>, vector<64x128xf32>,
    return
  }
  func.func @transform_0(%arg0: i32) -> (i32, i32) {
    %c0_i32 = arith.constant 0 : i32
    %c0_i32_0 = arith.constant 0 : i32
    return %arg0, %c0_i32 : i32, i32
  }
  func.func @transform_1(%arg0: i32) -> (i32, i32) {
    %c0_i32 = arith.constant 0 : i32
    %c0_i32_0 = arith.constant 0 : i32
    %c0_i32_1 = arith.constant 0 : i32
    return %c0_i32, %c0_i32_0 : i32, i32
  }
  func.func @transform_2(%arg0: i32) -> (i32, i32) {
    %c0_i32 = arith.constant 0 : i32
    %c0_i32_0 = arith.constant 0 : i32
    %c0_i32_1 = arith.constant 0 : i32
    return %c0_i32, %c0_i32_0 : i32, i32
  }
  func.func @transform_3(%arg0: i32) -> (i32, i32) {
    %c0_i32 = arith.constant 0 : i32
    %c0_i32_0 = arith.constant 0 : i32
    return %arg0, %c0_i32 : i32, i32
  }
}

</mosaic_0001>

<bundles_post_ra>
// kernel: tpu_custom_call.1
= control target key start
LH: loop header
LB: loop body
LE: loop exit
PB: predicated region body
PF: predicated region fallthrough
CT: control target
= control target key end

     0   :  { %8 = vsyncpa [#allocation3], 0  ;;  %s903_s0 = inlined_call_operand.hbm [shape: bf16[64,512], index: 0, kind: input, shape index: {}]   ;;  %s904_s1 = inlined_call_operand.hbm [shape: bf16[512,128], index: 1, kind: input, shape index: {}]   ;;  %s905_s2 = inlined_call_operand.vmem [shape: f32[1,128], index: 2, kind: input, shape index: {}]   ;;  %s906_s3 = inlined_call_operand.hbm [shape: f32[64,128], index: 3, kind: output, shape index: {}]  }
   0x1   :  { %9 = vsyncpa [#allocation6], 0 }
   0x2   :  { %10 = vsyncpa [#allocation4], 0  ;;  %s825_s12 = smov [#allocation2]   ;;  %s753_s16 = scalar_lea.hbm %s903_s0, 2048 }
   0x3   :  { %s16_s13 = sshll.u32 %s825_s12, 4  ;;  %p754_p0 = scmp.ne.s32.totalorder %s903_s0, %s753_s16  ;;  %s17_s13 = int_to_ptr.vmem [resolvable:$true] %s16_s13 }
   0x4   :  { %p757_p1 = scmp.lt.u32.totalorder %s753_s16, %s903_s0 }
   0x6   :  { %p759_p2 = pnand %p757_p1, %p754_p0 }
   0x8   :  { %762 = shalt.err (!%p759_p2)
}
   0x9   :  { %s763_s21 = scalar_lea.vmem %s17_s13, 2048  ;;  %p768_p4 = scmp.lt.s32.totalorder %s17_s13, %s17_s13 }
   0xa   :  { %p764_p3 = scmp.ne.s32.totalorder %s17_s13, %s763_s21  ;;  %p769_p5 = scmp.lt.s32.totalorder %s763_s21, %s763_s21 }
   0xc   :  { %p770_p6 = por %p769_p5, %p768_p4 }
   0xe   :  { %p771_p7 = pnand %p770_p6, %p764_p3 }
  0x10   :  { %774 = shalt.err (!%p771_p7)
}
  0x11   :  { %s826_s22 = smov 256   ;;  %s827_s23 = smov 16  }
  0x12   :  { %22 = dma.hbm_to_vmem [thread:$0]  %s903_s0, 2048, %s17_s13, [#allocation3], %s826_s22, %s826_s22, %s827_s23  }
  0x13   :  { %s828_s26 = smov [#allocation5]   ;;  %s775_s30 = scalar_lea.hbm %s904_s1, 4096 }
  0x14   :  { %s28_s27 = sshll.u32 %s828_s26, 4  ;;  %p776_p8 = scmp.ne.s32.totalorder %s904_s1, %s775_s30  ;;  %s29_s27 = int_to_ptr.vmem [resolvable:$true] %s28_s27 }
  0x15   :  { %p779_p9 = scmp.lt.u32.totalorder %s775_s30, %s904_s1 }
  0x17   :  { %p781_p10 = pnand %p779_p9, %p776_p8 }
  0x19   :  { %784 = shalt.err (!%p781_p10)
}
  0x1a   :  { %s785_s8 = scalar_lea.vmem %s29_s27, 4096  ;;  %p790_p12 = scmp.lt.s32.totalorder %s29_s27, %s29_s27 }
  0x1b   :  { %p786_p11 = scmp.ne.s32.totalorder %s29_s27, %s785_s8  ;;  %p791_p13 = scmp.lt.s32.totalorder %s785_s8, %s785_s8 }
  0x1d   :  { %p792_p0 = por %p791_p13, %p790_p12 }
  0x1f   :  { %p793_p1 = pnand %p792_p0, %p786_p11 }
  0x21   :  { %796 = shalt.err (!%p793_p1)
}
  0x22   :  { %s829_s0 = smov 64   ;;  %s830_s9 = smov 4  }
  0x23   :  { %34 = dma.hbm_to_vmem [thread:$0]  %s904_s1, 4096, %s29_s27, [#allocation6], %s829_s0, %s829_s0, %s830_s9  }
  0x24   :  { %819 = dma.done.wait [#allocation3], 2048  }
  0x25   :  { %820 = vsyncadd [#allocation3], 4294965248 }
  0x26   :  { %821 = dma.done.wait [#allocation6], 4096  }
  0x27   :  { %822 = vsyncadd [#allocation6], 4294963200  ;;  %v697_v0 = vld [vmem:[#allocation5 + $0x40] sm:$0xff]   ;;  %v701_v4 = vld [vmem:[#allocation5 + $0x48] sm:$0xff]  }
  0x28   :  { %v698_v1 = vld [vmem:[#allocation5 + $0xc0] sm:$0xff]   ;;  %608 = vmatprep.subr.bf16.mxu0 %v697_v0  ;;  %v702_v5 = vld [vmem:[#allocation5 + $0xc8] sm:$0xff]   ;;  %v705_v8 = vld [vmem:[#allocation5 + $0x50] sm:$0xff]  }
  0x29   :  { %v699_v2 = vld [vmem:[#allocation5] sm:$0xff]   ;;  %648 = vmatprep.subr.bf16.mxu1 %v698_v1  ;;  %v703_v6 = vld [vmem:[#allocation5 + $0x8] sm:$0xff]   ;;  %v706_v9 = vld [vmem:[#allocation5 + $0xd0] sm:$0xff]  }
  0x2a   :  { %v700_v3 = vld [vmem:[#allocation5 + $0x80] sm:$0xff]   ;;  %609 = vmatpush3.bf16.msra.mxu0 %v699_v2  ;;  %v704_v7 = vld [vmem:[#allocation5 + $0x88] sm:$0xff]   ;;  %v707_v10 = vld [vmem:[#allocation5 + $0x10] sm:$0xff]  }
  0x2b   :  { %649 = vmatpush3.bf16.msra.mxu1 %v700_v3  ;;  %610 = vmatprep.subr.bf16.mxu0 %v701_v4  ;;  %v708_v11 = vld [vmem:[#allocation5 + $0x90] sm:$0xff]   ;;  %v709_v12 = vld [vmem:[#allocation5 + $0x58] sm:$0xff]   ;;  %v713_v16 = vld [vmem:[#allocation5 + $0x60] sm:$0xff]  }
  0x2c   :  { %650 = vmatprep.subr.bf16.mxu1 %v702_v5  ;;  %v710_v13 = vld [vmem:[#allocation5 + $0xd8] sm:$0xff]   ;;  %v714_v17 = vld [vmem:[#allocation5 + $0xe0] sm:$0xff]   ;;  %v717_v20 = vld [vmem:[#allocation5 + $0x68] sm:$0xff]  }
  0x2d   :  { %v711_v14 = vld [vmem:[#allocation5 + $0x18] sm:$0xff]   ;;  %v715_v18 = vld [vmem:[#allocation5 + $0x20] sm:$0xff]   ;;  %v718_v21 = vld [vmem:[#allocation5 + $0xe8] sm:$0xff]  }
  0x2e   :  { %611 = vmatpush3.bf16.msra.mxu0 %v703_v6  ;;  %v712_v15 = vld [vmem:[#allocation5 + $0x98] sm:$0xff]   ;;  %v716_v19 = vld [vmem:[#allocation5 + $0xa0] sm:$0xff]   ;;  %v719_v22 = vld [vmem:[#allocation5 + $0x28] sm:$0xff]  }
  0x2f   :  { %651 = vmatpush3.bf16.msra.mxu1 %v704_v7  ;;  %612 = vmatprep.subr.bf16.mxu0 %v705_v8  ;;  %v720_v23 = vld [vmem:[#allocation5 + $0xa8] sm:$0xff]   ;;  %v721_v24 = vld [vmem:[#allocation5 + $0x70] sm:$0xff]   ;;  %v725_v28 = vld [vmem:[#allocation5 + $0x78] sm:$0xff]  }
  0x30   :  { %652 = vmatprep.subr.bf16.mxu1 %v706_v9  ;;  %v722_v25 = vld [vmem:[#allocation5 + $0xf0] sm:$0xff]   ;;  %v726_v29 = vld [vmem:[#allocation5 + $0xf8] sm:$0xff]   ;;  %v881_v50 = vld [vmem:[%s905_s2] ss:$0 sm:$0xff]  ;;  %s831_s2 = smov [#allocation7]  }
  0x31   :  { %v723_v26 = vld [vmem:[#allocation5 + $0x30] sm:$0xff]   ;;  %v727_v30 = vld [vmem:[#allocation5 + $0x38] sm:$0xff]   ;;  %s546_s13 = sshll.u32 %s831_s2, 4  ;;  %s547_s13 = int_to_ptr.vmem [resolvable:$true] %s546_s13 }
  0x32   :  { %613 = vmatpush3.bf16.msra.mxu0 %v707_v10  ;;  %v724_v27 = vld [vmem:[#allocation5 + $0xb0] sm:$0xff]   ;;  %v728_v31 = vld [vmem:[#allocation5 + $0xb8] sm:$0xff]   ;;  %s797_s14 = scalar_lea.vmem %s547_s13, 1024  ;;  %p802_p3 = scmp.lt.s32.totalorder %s547_s13, %s547_s13 }
  0x33   :  { %653 = vmatpush3.bf16.msra.mxu1 %v708_v11  ;;  %614 = vmatprep.subr.bf16.mxu0 %v709_v12  ;;  %v729_v32 = vld [vmem:[#allocation2] ss:$16 sps:$4 sm:$0xff]   ;;  %v731_v33 = vld [vmem:[#allocation2 + $0x4] ss:$16 sps:$4 sm:$0xff]   ;;  %v732_v34 = vld [vmem:[#allocation2 + $0x8] ss:$16 sps:$4 sm:$0xff]   ;;  %p798_p2 = scmp.ne.s32.totalorder %s547_s13, %s797_s14  ;;  %p803_p4 = scmp.lt.s32.totalorder %s797_s14, %s797_s14 }
  0x34   :  { %654 = vmatprep.subr.bf16.mxu1 %v710_v13  ;;  %v734_v35 = vld [vmem:[#allocation2 + $0xc] ss:$16 sps:$4 sm:$0xff]   ;;  %435 = vmatprep.mubr.bf16.mxu0 %v731_v33  ;;  %v735_v36 = vld [vmem:[#allocation2 + $0x24] ss:$16 sps:$4 sm:$0xff]   ;;  %v739_v38 = vld [vmem:[#allocation2 + $0x20] ss:$16 sps:$4 sm:$0xff]  }
  0x35   :  { %500 = vmatprep.mubr.bf16.mxu1 %v734_v35  ;;  %v737_v37 = vld [vmem:[#allocation2 + $0x2c] ss:$16 sps:$4 sm:$0xff]   ;;  %v740_v39 = vld [vmem:[#allocation2 + $0x28] ss:$16 sps:$4 sm:$0xff]   ;;  %v741_v40 = vld [vmem:[#allocation2 + $0x44] ss:$16 sps:$4 sm:$0xff]   ;;  %p804_p5 = por %p803_p4, %p802_p3 }
  0x36   :  { %615 = vmatpush3.bf16.msra.mxu0 %v711_v14  ;;  %v743_v41 = vld [vmem:[#allocation2 + $0x4c] ss:$16 sps:$4 sm:$0xff]   ;;  %v745_v42 = vld [vmem:[#allocation2 + $0x40] ss:$16 sps:$4 sm:$0xff]   ;;  %v746_v43 = vld [vmem:[#allocation2 + $0x48] ss:$16 sps:$4 sm:$0xff]  }
  0x37   :  { %655 = vmatpush3.bf16.msra.mxu1 %v712_v15  ;;  %616 = vmatprep.subr.bf16.mxu0 %v713_v16  ;;  %v747_v44 = vld [vmem:[#allocation2 + $0x64] ss:$16 sps:$4 sm:$0xff]   ;;  %v749_v45 = vld [vmem:[#allocation2 + $0x6c] ss:$16 sps:$4 sm:$0xff]   ;;  %v751_v46 = vld [vmem:[#allocation2 + $0x60] ss:$16 sps:$4 sm:$0xff]   ;;  %p805_p6 = pnand %p804_p5, %p798_p2 }
  0x38   :  { %656 = vmatprep.subr.bf16.mxu1 %v714_v17  ;;  %v752_v47 = vld [vmem:[#allocation2 + $0x68] ss:$16 sps:$4 sm:$0xff]  }
  0x3a   :  { %617 = vmatpush3.bf16.msra.mxu0 %v715_v18 }
  0x3b   :  { %657 = vmatpush3.bf16.msra.mxu1 %v716_v19  ;;  %618 = vmatprep.subr.bf16.mxu0 %v717_v20 }
  0x3c   :  { %658 = vmatprep.subr.bf16.mxu1 %v718_v21 }
  0x3e   :  { %619 = vmatpush3.bf16.msra.mxu0 %v719_v22 }
  0x3f   :  { %659 = vmatpush3.bf16.msra.mxu1 %v720_v23  ;;  %620 = vmatprep.subr.bf16.mxu0 %v721_v24 }
  0x40   :  { %660 = vmatprep.subr.bf16.mxu1 %v722_v25 }
  0x42   :  { %621 = vmatpush3.bf16.msra.mxu0 %v723_v26 }
  0x43   :  { %661 = vmatpush3.bf16.msra.mxu1 %v724_v27  ;;  %622 = vmatprep.subr.bf16.mxu0 %v725_v28 }
  0x44   :  { %662 = vmatprep.subr.bf16.mxu1 %v726_v29 }
  0x46   :  { %623 = vmatpush3.bf16.msra.mxu0 %v727_v30 }
  0x47   :  { %663 = vmatpush3.bf16.msra.mxu1 %v728_v31 }
  0x49   :  { %436 = vmatmul.mubr.bf16.vlgmr.msra.gmra.mrb[0].mxu0 %v729_v32 }
  0x4a   :  { %501 = vmatmul.mubr.bf16.vlgmr.msra.gmra.mrb[0].mxu1 %v732_v34  ;;  %443 = vmatprep.mubr.bf16.mxu0 %v735_v36 }
  0x4b   :  { %508 = vmatprep.mubr.bf16.mxu1 %v737_v37 }
  0x51   :  { %444 = vmatmul.mubr.bf16.gmra.mrb[4].mxu0 %v739_v38 }
  0x52   :  { %509 = vmatmul.mubr.bf16.gmra.mrb[4].mxu1 %v740_v39  ;;  %451 = vmatprep.mubr.bf16.mxu0 %v741_v40 }
  0x53   :  { %516 = vmatprep.mubr.bf16.mxu1 %v743_v41 }
  0x59   :  { %452 = vmatmul.mubr.bf16.gmra.mrb[8].mxu0 %v745_v42 }
  0x5a   :  { %517 = vmatmul.mubr.bf16.gmra.mrb[8].mxu1 %v746_v43  ;;  %459 = vmatprep.mubr.bf16.mxu0 %v747_v44 }
  0x5b   :  { %524 = vmatprep.mubr.bf16.mxu1 %v749_v45 }
  0x61   :  { %460 = vmatmul.mubr.bf16.gmra.mrb[12].mxu0 %v751_v46 }
  0x62   :  { %525 = vmatmul.mubr.bf16.gmra.mrb[12].mxu1 %v752_v47 }
 0x11c   :  { %v624_v48 = vpop.f32.mrb[0].mxu0 }
 0x11d   :  { %v664_v49 = vpop.f32.mrb[0].mxu1  ;;  %v625_v51 = vpop.f32.mrb[1].mxu0 }
 0x11e   :  { %v626_v52 = vadd.f32 %v625_v51, %v624_v48  ;;  %v665_v53 = vpop.f32.mrb[1].mxu1  ;;  %v627_v54 = vpop.f32.mrb[2].mxu0 }
 0x11f   :  { %v666_v55 = vadd.f32 %v665_v53, %v664_v49  ;;  %v667_v56 = vpop.f32.mrb[2].mxu1  ;;  %v628_v57 = vpop.f32.mrb[3].mxu0 }
 0x120   :  { %v438_v58 = vadd.f32 %v626_v52, %v881_v50  ;;  %v629_v59 = vadd.f32 %v628_v57, %v627_v54  ;;  %v668_v60 = vpop.f32.mrb[3].mxu1 }
 0x121   :  { %v669_v61 = vadd.f32 %v668_v60, %v667_v56 }
 0x122   :  { %v503_v62 = vadd.f32 %v666_v55, %v438_v58  ;;  %v441_v63 = vadd.f32 %v629_v59, %v881_v50 }
 0x124   :  { %533 = vst [vmem:[#allocation7] sm:$0xff] %v503_v62  ;;  %v506_v0 = vadd.f32 %v669_v61, %v441_v63  ;;  %v630_v1 = vpop.f32.mrb[4].mxu0 }
 0x125   :  { %v670_v2 = vpop.f32.mrb[4].mxu1  ;;  %v631_v3 = vpop.f32.mrb[5].mxu0 }
 0x126   :  { %534 = vst [vmem:[#allocation7 + $0x8] sm:$0xff] %v506_v0  ;;  %v632_v4 = vadd.f32 %v631_v3, %v630_v1  ;;  %v671_v5 = vpop.f32.mrb[5].mxu1  ;;  %v633_v6 = vpop.f32.mrb[6].mxu0 }
 0x127   :  { %v672_v7 = vadd.f32 %v671_v5, %v670_v2  ;;  %v673_v8 = vpop.f32.mrb[6].mxu1  ;;  %v634_v9 = vpop.f32.mrb[7].mxu0 }
 0x128   :  { %v446_v10 = vadd.f32 %v632_v4, %v881_v50  ;;  %v635_v11 = vadd.f32 %v634_v9, %v633_v6  ;;  %v674_v12 = vpop.f32.mrb[7].mxu1 }
 0x129   :  { %v675_v13 = vadd.f32 %v674_v12, %v673_v8 }
 0x12a   :  { %v511_v14 = vadd.f32 %v672_v7, %v446_v10  ;;  %v449_v15 = vadd.f32 %v635_v11, %v881_v50 }
 0x12c   :  { %535 = vst [vmem:[#allocation7 + $0x10] sm:$0xff] %v511_v14  ;;  %v514_v16 = vadd.f32 %v675_v13, %v449_v15  ;;  %v636_v17 = vpop.f32.mrb[8].mxu0 }
 0x12d   :  { %v676_v18 = vpop.f32.mrb[8].mxu1  ;;  %v637_v19 = vpop.f32.mrb[9].mxu0 }
 0x12e   :  { %536 = vst [vmem:[#allocation7 + $0x18] sm:$0xff] %v514_v16  ;;  %v638_v20 = vadd.f32 %v637_v19, %v636_v17  ;;  %v677_v21 = vpop.f32.mrb[9].mxu1  ;;  %v639_v22 = vpop.f32.mrb[10].mxu0 }
 0x12f   :  { %v678_v23 = vadd.f32 %v677_v21, %v676_v18  ;;  %v679_v24 = vpop.f32.mrb[10].mxu1  ;;  %v640_v25 = vpop.f32.mrb[11].mxu0 }
 0x130   :  { %v454_v26 = vadd.f32 %v638_v20, %v881_v50  ;;  %v641_v27 = vadd.f32 %v640_v25, %v639_v22  ;;  %v680_v28 = vpop.f32.mrb[11].mxu1 }
 0x131   :  { %v681_v29 = vadd.f32 %v680_v28, %v679_v24 }
 0x132   :  { %v519_v30 = vadd.f32 %v678_v23, %v454_v26  ;;  %v457_v31 = vadd.f32 %v641_v27, %v881_v50 }
 0x134   :  { %537 = vst [vmem:[#allocation7 + $0x20] sm:$0xff] %v519_v30  ;;  %v522_v32 = vadd.f32 %v681_v29, %v457_v31  ;;  %v642_v33 = vpop.f32.mrb[12].mxu0 }
 0x135   :  { %v682_v34 = vpop.f32.mrb[12].mxu1  ;;  %v643_v35 = vpop.f32.mrb[13].mxu0 }
 0x136   :  { %538 = vst [vmem:[#allocation7 + $0x28] sm:$0xff] %v522_v32  ;;  %v644_v36 = vadd.f32 %v643_v35, %v642_v33  ;;  %v683_v37 = vpop.f32.mrb[13].mxu1  ;;  %v645_v38 = vpop.f32.mrb[14].mxu0 }
 0x137   :  { %v684_v39 = vadd.f32 %v683_v37, %v682_v34  ;;  %v685_v40 = vpop.f32.mrb[14].mxu1  ;;  %v646_v41 = vpop.f32.mrb[15].mxu0 }
 0x138   :  { %v462_v42 = vadd.f32 %v644_v36, %v881_v50  ;;  %v647_v43 = vadd.f32 %v646_v41, %v645_v38  ;;  %v686_v44 = vpop.f32.mrb[15].mxu1 }
 0x139   :  { %v687_v45 = vadd.f32 %v686_v44, %v685_v40 }
 0x13a   :  { %v527_v46 = vadd.f32 %v684_v39, %v462_v42  ;;  %v465_v47 = vadd.f32 %v647_v43, %v881_v50 }
 0x13c   :  { %539 = vst [vmem:[#allocation7 + $0x30] sm:$0xff] %v527_v46  ;;  %v530_v48 = vadd.f32 %v687_v45, %v465_v47 }
 0x13e   :  { %540 = vst [vmem:[#allocation7 + $0x38] sm:$0xff] %v530_v48 }
 0x13f   :  { %808 = shalt.err (!%p805_p6)
}
 0x140   :  { %s809_s17 = scalar_lea.hbm %s906_s3, 1024 }
 0x141   :  { %p810_p7 = scmp.ne.s32.totalorder %s906_s3, %s809_s17  ;;  %p813_p8 = scmp.lt.u32.totalorder %s809_s17, %s906_s3 }
 0x143   :  { %p815_p9 = pnand %p813_p8, %p810_p7 }
 0x145   :  { %818 = shalt.err (!%p815_p9)
}
 0x146   :  { %s832_s22 = smov 128   ;;  %s833_s23 = smov 8  }
 0x147   :  { %552 = dma.vmem_to_hbm [thread:$0]  %s547_s13, 1024, %s906_s3, [#allocation4], %s832_s22, %s832_s22, %s833_s23  }
 0x148   :  { %823 = dma.done.wait [#allocation4], 1024  }
 0x149   :  { %824 = vsyncadd [#allocation4], 4294966272 }
 0x14a   :  { %556 = vsyncpa [#allocation3], 1 }
 0x14b   :  { %557 = vsyncpa [#allocation6], 1 }
 0x14c   :  { %558 = vsyncpa [#allocation4], 1 }

</bundles_post_ra>
